<compile_context>
chip_gen: v5e
topology: v5e:2x2
jax: 0.10.0
libtpu: 0.0.40
codegen_flags: <defaults>
</compile_context>

<pallas_src>
import functools

import jax
import jax.numpy as jnp
from jax.experimental import pallas as pl
from jax.experimental.pallas import tpu as pltpu


def _round_up(x, m):
    return (x + m - 1) // m * m


_ROW_TILE_CAP = 512      # max token rows per grid step (v6e/v7x MXU pass is 256 wide)
_SUB_IMAGE_TILE = 256    # row tile used when one image's tokens exceed the cap


def _plan_rows(batch, tokens_per_image, row_align):
    """Row tiling plan.  Returns (t_pad, tm, imgs_per_tile)."""
    t_pad = _round_up(tokens_per_image, row_align)
    if t_pad > _ROW_TILE_CAP:
        # Large images: tile *within* an image (addend indexed by row-in-image)
        # so VMEM stays bounded on v7x (64 MiB) / default scoped limits.
        tm = _SUB_IMAGE_TILE
        t_pad = _round_up(tokens_per_image, tm)
        return t_pad, tm, 1
    # Small images: pack j whole images per row tile (up to 512 rows) but keep
    # >= 2 row steps so megacore / both v7x TensorCores get work.
    j = 1
    for cand in range(2, batch + 1):
        if batch % cand == 0 and cand * t_pad <= _ROW_TILE_CAP and batch // cand >= 2:
            j = cand
    return t_pad, j * t_pad, j


def _patch_embed_kernel(x_ref, w_ref, add_ref, o_ref):
    # x_ref:   (TM, K_pad)   compute-dtype patch rows (row 0 of each image: zeros)
    # w_ref:   (K_pad, TN)   compute-dtype conv-weight stripe (resident)
    # add_ref: (TM, TN)      f32 additive table: cls_token / (conv_b + pos_embed)
    # o_ref:   (TM, TN)      output tile (lane-dense, multiple of 128 lanes)
    acc = jnp.dot(x_ref[...], w_ref[...], preferred_element_type=jnp.float32)
    o_ref[...] = (acc + add_ref[...]).astype(o_ref.dtype)


def patch_embed_forward(x, conv_w, conv_b, pos_embed, cls_token, patch_size,
                        compute_dtype=jnp.bfloat16, out_dtype=jnp.float32,
                        return_padded=False):
    """x: [B, C, H, W] float32 (NCHW, matching nn.Conv2d).

    Returns (tokens [B, 1+N, D], None, None) — the relative_attention=False path.
    With return_padded=True, tokens is [B, T_pad, D_pad] (pad rows/lanes are
    exact zeros), which avoids the depad slice for consumers that can take it.
    """
    B, C, H, W = x.shape
    assert H == W
    ph, pw = patch_size
    assert H % ph == 0 and W % pw == 0
    hp, wp = H // ph, W // pw
    N = hp * wp
    D = conv_w.shape[0]
    K = C * ph * pw
    # pos_embed covers exactly the N patch tokens (no CLS row) in this module.
    assert pos_embed.shape[-2] == N and pos_embed.shape[-1] == D

    T = N + 1                                             # CLS token + patches
    row_align = 16 if jnp.dtype(compute_dtype).itemsize == 2 else 8
    T_pad, TM, j = _plan_rows(B, T, row_align)
    D_pad = _round_up(D, 128)                             # lane-dense output stores
    K_pad = K if K <= 128 else _round_up(K, 128)          # align contraction for ViT-size K
    M = B * T_pad
    n_row = M // TM

    # Column split over D only when a single row step would leave one v7x
    # TensorCore idle and D_pad halves into 128-lane stripes.
    TN = D_pad // 2 if (n_row < 2 and D_pad % 256 == 0) else D_pad
    n_col = D_pad // TN
    grid = (n_col, n_row)                                 # columns outer: weight stripe resident

    # --- glue: extract non-overlapping patches, flatten as (c, p, q) ---
    # Cast to compute_dtype here so the patchify transpose writes half the bytes.
    patches = x.reshape(B, C, hp, ph, wp, pw)
    patches = patches.transpose(0, 2, 4, 1, 3, 5).reshape(B, N, K)
    patches = patches.astype(compute_dtype)
    # Prepend one zero "CLS patch" row per image, pad rows to T_pad and K to K_pad.
    patches = jnp.pad(patches, ((0, 0), (1, T_pad - T), (0, K_pad - K)))
    patches = patches.reshape(M, K_pad)

    # Conv weight as a [K_pad, D_pad] matmul operand.
    w_mat = conv_w.reshape(D, K).T.astype(compute_dtype)
    w_mat = jnp.pad(w_mat, ((0, K_pad - K), (0, D_pad - D)))

    # Additive table: row 0 = cls_token, rows 1..N = conv bias + pos_embed,
    # pad rows/lanes = 0 (keeps the padded-output-zeros invariant).
    addend = jnp.concatenate(
        [cls_token.reshape(1, D).astype(jnp.float32),
         pos_embed.reshape(N, D).astype(jnp.float32)
         + conv_b.reshape(1, D).astype(jnp.float32)],
        axis=0)                                                  # [T, D]
    addend = jnp.pad(addend, ((0, T_pad - T), (0, D_pad - D)))   # [T_pad, D_pad]
    if j > 1:
        addend = jnp.tile(addend, (j, 1))                        # [TM, D_pad]
    a_blocks = addend.shape[0] // TM                             # row blocks per image (or 1)

    if a_blocks == 1:
        add_map = lambda c, r: (0, c)                            # resident across rows
    else:
        add_map = lambda c, r: (r % a_blocks, c)                 # row-within-image

    # Explicit VMEM budget (double-buffered streams + resident operands + slack).
    lhs_b = jnp.dtype(compute_dtype).itemsize
    out_b = jnp.dtype(out_dtype).itemsize
    vmem_bytes = (2 * TM * K_pad * lhs_b + 2 * K_pad * TN * lhs_b
                  + 2 * TM * TN * 4 + 2 * TM * TN * out_b + (2 << 20))
    vmem_limit = min(max(vmem_bytes, 32 << 20), 128 << 20)

    out = pl.pallas_call(
        _patch_embed_kernel,
        out_shape=jax.ShapeDtypeStruct((M, D_pad), out_dtype),
        grid_spec=pltpu.PrefetchScalarGridSpec(
            num_scalar_prefetch=0,
            grid=grid,
            in_specs=[
                pl.BlockSpec((TM, K_pad), lambda c, r: (r, 0)),   # patch rows (streamed)
                pl.BlockSpec((K_pad, TN), lambda c, r: (0, c)),   # weight stripe (resident)
                pl.BlockSpec((TM, TN), add_map),                  # additive table
            ],
            out_specs=pl.BlockSpec((TM, TN), lambda c, r: (r, c)),
        ),
        compiler_params=pltpu.CompilerParams(
            dimension_semantics=("parallel", "parallel"),
            vmem_limit_bytes=vmem_limit),
    )(patches, w_mat, addend)

    tokens_padded = out.reshape(B, T_pad, D_pad)
    if return_padded:
        # Pad rows/lanes are exact zeros (zero patch rows and zero addend pad),
        # so the consumer can use this layout and skip the depad HBM pass.
        return tokens_padded, None, None
    tokens = tokens_padded[:, :T, :D]
    # Dropout is identity in eval mode; relative_attention=False -> (None, None).
    return tokens, None, None


def _reference(x, conv_w, conv_b, pos_embed, cls_token, patch_size):
    B, C, H, W = x.shape
    ph, pw = patch_size
    hp, wp = H // ph, W // pw
    N, D, K = hp * wp, conv_w.shape[0], C * ph * pw
    p = x.reshape(B, C, hp, ph, wp, pw).transpose(0, 2, 4, 1, 3, 5).reshape(B, N, K)
    body = jnp.matmul(p, conv_w.reshape(D, K).T,
                      precision=jax.lax.Precision.HIGHEST) + conv_b + pos_embed.reshape(1, N, D)
    cls = jnp.broadcast_to(cls_token.reshape(1, 1, D), (B, 1, D))
    return jnp.concatenate([cls, body], axis=1)


def _run_case(key, B, C, H, ph, D, out_dtype=jnp.float32):
    kx, kw, kb, kp, kc = jax.random.split(key, 5)
    W = H
    N = (H // ph) * (W // ph)
    x = jax.random.normal(kx, (B, C, H, W), dtype=jnp.float32)
    conv_w = jax.random.normal(kw, (D, C, ph, ph), dtype=jnp.float32) * 0.02
    conv_b = jax.random.normal(kb, (D,), dtype=jnp.float32) * 0.02
    pos_embed = jax.random.normal(kp, (1, N, D), dtype=jnp.float32) * 0.02
    cls_token = jax.random.normal(kc, (1, 1, D), dtype=jnp.float32) * 0.02

    fwd = jax.jit(functools.partial(patch_embed_forward, patch_size=(ph, ph),
                                    out_dtype=out_dtype))
    tokens, row_embed, column_embed = fwd(x, conv_w, conv_b, pos_embed, cls_token)
    jax.block_until_ready(tokens)

    assert tokens.shape == (B, N + 1, D)
    assert tokens.dtype == out_dtype
    assert row_embed is None and column_embed is None
    ref = _reference(x, conv_w, conv_b, pos_embed, cls_token, (ph, ph))
    got = tokens.astype(jnp.float32)
    max_err = float(jnp.max(jnp.abs(got - ref)))
    # bf16 matmul operands (and optional bf16 store) -> ~1e-3 level error here.
    assert jnp.allclose(got, ref, atol=3e-2, rtol=3e-2), max_err
    return max_err


if __name__ == "__main__":
    key = jax.random.PRNGKey(0)
    k1, k2, k3 = jax.random.split(key, 3)

    # 1) Small module-consistent config: B=2, C=4, 16x16 image, patch 4, D=32.
    #    -> T_pad=32, TM=32, grid (1, 2): row-tiled, no column split.
    _run_case(k1, B=2, C=4, H=16, ph=4, D=32)

    # 2) Single image, wider embed: exercises the D-column split that keeps both
    #    v7x TensorCores busy, plus the bf16-output knob. -> grid (2, 1), TN=128.
    _run_case(k2, B=1, C=3, H=16, ph=4, D=256, out_dtype=jnp.bfloat16)

    # 3) Larger image: exercises sub-image row tiling with the addend indexed by
    #    row-within-image. -> T=577, T_pad=768, TM=256, grid (1, 3).
    _run_case(k3, B=1, C=3, H=96, ph=4, D=32)

    print("KERNEL_OK")
</pallas_src>

<mosaic_0001>
module attributes {stable_mosaic.version = 11 : i64} {
  func.func @_patch_embed_kernel(%arg0: i32, %arg1: i32, %arg2: memref<32x64xbf16, #tpu.memory_space<vmem>>, %arg3: memref<64x128xbf16, #tpu.memory_space<vmem>>, %arg4: memref<32x128xf32, #tpu.memory_space<vmem>>, %arg5: memref<32x128xf32, #tpu.memory_space<vmem>>) attributes {dimension_semantics = [#tpu.dimension_semantics<parallel>, #tpu.dimension_semantics<parallel>], iteration_bounds = array<i64: 1, 2>, scalar_prefetch = 0 : i64, scratch_operands = 0 : i64, tpu.core_type = #tpu.core_type<tc>, window_params = [{transform_indices = @transform_0, window_bounds = array<i64: 32, 64>}, {transform_indices = @transform_1, window_bounds = array<i64: 64, 128>}, {transform_indices = @transform_2, window_bounds = array<i64: 32, 128>}, {transform_indices = @transform_3, window_bounds = array<i64: 32, 128>}]} {
    %c0 = arith.constant 0 : index
    %c0_0 = arith.constant 0 : index
    %0 = vector.load %arg2[%c0, %c0_0] : memref<32x64xbf16, #tpu.memory_space<vmem>>, vector<32x64xbf16>
    %c0_1 = arith.constant 0 : index
    %c0_2 = arith.constant 0 : index
    %1 = vector.load %arg3[%c0_1, %c0_2] : memref<64x128xbf16, #tpu.memory_space<vmem>>, vector<64x128xbf16>
    %cst = arith.constant dense<0.000000e+00> : vector<32x128xf32>
    %2 = tpu.matmul %0, %1, %cst {dimension_numbers = #tpu.dot_dimension_numbers<[1], [0], [0], [1], [0, 0, 1, 1], [], []>} : vector<32x64xbf16>, vector<64x128xbf16>, vector<32x128xf32> -> vector<32x128xf32>
    %c0_3 = arith.constant 0 : index
    %c0_4 = arith.constant 0 : index
    %3 = vector.load %arg4[%c0_3, %c0_4] : memref<32x128xf32, #tpu.memory_space<vmem>>, vector<32x128xf32>
    %4 = arith.addf %2, %3 : vector<32x128xf32>
    %c0_5 = arith.constant 0 : index
    %c0_6 = arith.constant 0 : index
    %5 = vector.load %arg5[%c0_5, %c0_6] : memref<32x128xf32, #tpu.memory_space<vmem>>, vector<32x128xf32>
    tpu.vector_store %arg5[%c0_5, %c0_6], %4 {strides = array<i32>} : memref<32x128xf32, #tpu.memory_space<vmem>>, vector<32x128xf32>,
    return
  }
  func.func @transform_0(%arg0: i32, %arg1: i32) -> (i32, i32) {
    %c0_i32 = arith.constant 0 : i32
    %c0_i32_0 = arith.constant 0 : i32
    return %arg1, %c0_i32 : i32, i32
  }
  func.func @transform_1(%arg0: i32, %arg1: i32) -> (i32, i32) {
    %c0_i32 = arith.constant 0 : i32
    %c0_i32_0 = arith.constant 0 : i32
    return %c0_i32, %arg0 : i32, i32
  }
  func.func @transform_2(%arg0: i32, %arg1: i32) -> (i32, i32) {
    %c0_i32 = arith.constant 0 : i32
    %c0_i32_0 = arith.constant 0 : i32
    return %c0_i32, %arg0 : i32, i32
  }
  func.func @transform_3(%arg0: i32, %arg1: i32) -> (i32, i32) {
    %c0_i32 = arith.constant 0 : i32
    return %arg1, %arg0 : i32, i32
  }
}

</mosaic_0001>

<bundles_post_ra>
// kernel: patch_embed_forward.1
= control target key start
LH: loop header
LB: loop body
LE: loop exit
PB: predicated region body
PF: predicated region fallthrough
CT: control target
= control target key end

     0   :  { %s531_s12 = smov 0   ;;  %s533_s13 = smov 0   ;;  %s588_s0 = inlined_call_operand.vmem [shape: bf16[64,64], index: 0, kind: input, shape index: {}]   ;;  %s589_s1 = inlined_call_operand.vmem [shape: bf16[64,128], index: 1, kind: input, shape index: {}]   ;;  %s590_s2 = inlined_call_operand.vmem [shape: f32[32,128], index: 2, kind: input, shape index: {}]   ;;  %s591_s3 = inlined_call_operand.vmem [shape: f32[64,128], index: 3, kind: output, shape index: {}]  }
   0x1   :  { %s535_s14 = smov 0  }
   0x2 LB: > { %s22_s15 = sadd.s32 1, %s505_s13  ;;  %p420_p0 = scmp.ge.s32.totalorder %s509_s14, 1  ;;  %s509_s14 = sphi %s535_s14, %s13_s14   ;;  %s505_s13 = sphi %s533_s13, %s593_s13   ;;  %s501_s12 = sphi %s531_s12, %s592_s12  }
   0x3   : > { %p23_p1 = scmp.ge.s32.totalorder %s22_s15, 2  ;;  %p170_p2 = scmp.lt.s32.totalorder %s509_s14, 3 }
   0x5   : > { %s595_s15 = smov (%p23_p1, %s22_s15), 0  ;;  %p171_p3 = pnand %p420_p0, %p170_p2 }
   0x6   : > { %s421_s18 = sshll.u32 (!%p171_p3), %s501_s12, 2 }
   0x7   : > { %174 = sbr.rel (%p171_p3) target bundleno = 166 (0xa6), region = 32  ;;  %p206_p4 = scmp.lt.s32.totalorder (!%p171_p3), %s421_s18, 7 }
   0xc   : > { %v458_v0 = vld [vmem:[%s589_s1 + $0x18] sm:$0xff]  ;;  %v457_v1 = vld [vmem:[%s589_s1 + $0x10] sm:$0xff]  ;;  %s597_s18 = smov (!%p206_p4, %s421_s18), 7  ;;  %v456_v2 = vld [vmem:[%s589_s1 + $0x8] sm:$0xff]  ;;  %vm279_vm0 = vcmask 523264  }
   0xd   : > { %290 = vmatpush.bf16.msra.mxu0 %v458_v0  ;;  %459 = vmatpush.bf16.msra.mxu1 %v458_v0  ;;  %s422_s23 = sshll.u32 %s597_s18, 2  ;;  %v455_v3 = vld [vmem:[%s589_s1] sm:$0xff]  ;;  %s424_s29 = sshll.u32 %s597_s18, 3  ;;  %v242_v10 = vld [vmem:[%s590_s2 + $0x8] sm:$0xff]  ;;  %v243_v11 = vld [vmem:[%s590_s2 + $0x10] sm:$0xff] }
   0xe   : > { %s209_s28 = scalar_lea.vmem %s588_s0, %s422_s23  ;;  %v241_v6 = vld [vmem:[%s590_s2] sm:$0xff]  ;;  %s226_s7 = scalar_lea.vmem %s591_s3, %s424_s29  ;;  %v244_v13 = vld [vmem:[%s590_s2 + $0x18] sm:$0xff] }
   0xf   : > { %v453_v4 = vld [vmem:[%s209_s28] sm:$0xff]  ;;  %v454_v5 = vld [vmem:[%s209_s28 + $0x8] sm:$0xff] }
  0x11   : > { %291 = vmatpush.bf16.msra.mxu0 %v457_v1  ;;  %460 = vmatpush.bf16.msra.mxu1 %v457_v1 }
  0x15   : > { %292 = vmatpush.bf16.msra.mxu0 %v456_v2  ;;  %461 = vmatpush.bf16.msra.mxu1 %v456_v2 }
  0x19   : > { %293 = vmatpush.bf16.msra.mxu0 %v455_v3  ;;  %462 = vmatpush.bf16.msra.mxu1 %v455_v3 }
  0x1c   : > { %449 = vmatmul.msk.bf16.vlgmr.msra.gmra.mxu0 %vm279_vm0, %v453_v4  ;;  %450 = vmatmul.msk.bf16.vlgmr.msra.gmra.mxu1 %vm279_vm0, %v454_v5 }
  0x99   : > { %v295_v7 = vpop.f32.mrf.mxu0  ;;  %v300_v8 = vpop.f32.mrf.mxu1 }
  0x9a   : > { %v296_v9 = vadd.f32 %v295_v7, %v241_v6  ;;  %v301_v16 = vadd.f32 %v300_v8, %v243_v11 }
  0x9c   : > { %305 = vst [vmem:[%s226_s7] sm:$0xff] %v296_v9 }
  0x9d   : > { %307 = vst [vmem:[%s226_s7 + $0x10] sm:$0xff] %v301_v16 }
  0xa1   : > { %v297_v12 = vpop.f32.mrf.mxu0  ;;  %v302_v14 = vpop.f32.mrf.mxu1 }
  0xa2   : > { %v298_v15 = vadd.f32 %v297_v12, %v242_v10  ;;  %v303_v17 = vadd.f32 %v302_v14, %v244_v13 }
  0xa4   : > { %306 = vst [vmem:[%s226_s7 + $0x8] sm:$0xff] %v298_v15 }
  0xa5   : > { %308 = vst [vmem:[%s226_s7 + $0x18] sm:$0xff] %v303_v17 }
  0xa6 PF: > { %s13_s14 = sadd.s32 1, %s509_s14   ;;  %s592_s12 = smov %s505_s13 }
  0xa7   : > { %p10_p5 = scmp.ge.s32.totalorder %s13_s14, 4   ;;  %s593_s13 = smov %s595_s15 }
  0xa9   :  { %12 = sbr.rel (!%p10_p5) target bundleno = 2 (0x2), region = 68 }

</bundles_post_ra>
